<compile_context>
chip_gen: v5e
topology: v5e:2x2
jax: 0.10.0
libtpu: 0.0.40
codegen_flags: <defaults>
</compile_context>

<pallas_src>
import jax
import jax.numpy as jnp
from jax.experimental import pallas as pl
from jax.experimental.pallas import tpu as pltpu


def _identity_dma_kernel(x_hbm, o_hbm, sem):
    # Single whole-array HBM->HBM DMA: no VMEM staging, no vld/vst body work,
    # all VLIW slots and all of VMEM stay free.
    cp = pltpu.make_async_copy(x_hbm, o_hbm, sem)
    cp.start()
    cp.wait()


def base_model_forward(x):
    """Faithful BaseModel.forward.

    The reference forward body is `None` (no layers, no math), so the only
    correct — and fastest — implementation is a pass-through with no kernel
    launch at all.
    """
    # TODO(synk): reference forward() returns None (no ops); identity
    #             pass-through is the only faithful behavior available.
    return x


def base_model_forward_pallas(x):
    """Optional Pallas pass-through (demo / harness path).

    If a kernel must be emitted, it is a single HBM->HBM DMA of the whole
    array (memory_space=pl.ANY on both operands), not a tiled VMEM round
    trip. No input/output aliasing, so donation semantics match the no-kernel
    fast path above.
    """
    orig_shape = x.shape
    total = x.size
    if total == 0:
        return x

    # Present the simplest lane-dense view when available (metadata-only
    # reshape of a contiguous array); otherwise fall back to a flat 1-D copy.
    if total % 128 == 0:
        xf = x.reshape(total // 128, 128)
    else:
        xf = x.reshape(total)

    itemsize = jnp.dtype(x.dtype).itemsize
    out = pl.pallas_call(
        _identity_dma_kernel,
        out_shape=jax.ShapeDtypeStruct(xf.shape, xf.dtype),
        in_specs=[pl.BlockSpec(memory_space=pl.ANY)],
        out_specs=pl.BlockSpec(memory_space=pl.ANY),
        scratch_shapes=[pltpu.SemaphoreType.DMA],
        cost_estimate=pl.CostEstimate(
            flops=0,
            transcendentals=0,
            bytes_accessed=2 * total * itemsize,
        ),
    )(xf)
    return out.reshape(orig_shape)


class BaseModelPallas:
    """Mirror of the PyTorch BaseModel skeleton (no parameters, empty ups/downs)."""

    def __init__(self, kernel, num_filters, num_colors, in_channels=1, padding=1):
        # The reference __init__ only builds empty ModuleLists; no weights exist.
        self.kernel = kernel
        self.num_filters = num_filters
        self.num_colors = num_colors
        self.in_channels = in_channels
        self.padding = padding
        self.ups = []    # nn.ModuleList() equivalent (empty)
        self.downs = []  # nn.ModuleList() equivalent (empty)

    def __call__(self, x):
        return base_model_forward(x)


if __name__ == "__main__":
    key = jax.random.PRNGKey(0)
    # Small shapes consistent with the constructor signature.
    N, C, H, W = 2, 4, 16, 16
    x = jax.random.normal(key, (N, C, H, W), dtype=jnp.float32)

    model = BaseModelPallas(kernel=3, num_filters=4, num_colors=3,
                            in_channels=C, padding=1)

    # Fast path: the faithful no-op forward (zero kernel launches).
    y = jax.block_until_ready(model(x))
    assert y.shape == (N, C, H, W)
    assert y.dtype == x.dtype

    # Demonstrate the Pallas HBM->HBM DMA pass-through runs cleanly on TPU.
    z = jax.block_until_ready(base_model_forward_pallas(x))
    assert z.shape == (N, C, H, W)
    assert z.dtype == x.dtype
    assert bool(jnp.allclose(z, x)), "identity pass-through mismatch"

    print("KERNEL_OK")
</pallas_src>

<mosaic_0001>
module attributes {stable_mosaic.version = 11 : i64} {
  func.func @_identity_dma_kernel(%arg0: memref<16x128xf32, #tpu.memory_space<any>>, %arg1: memref<16x128xf32, #tpu.memory_space<any>>, %arg2: memref<!tpu.dma_semaphore, #tpu.memory_space<semaphore_mem>>) attributes {dimension_semantics = [], scalar_prefetch = 0 : i64, scratch_operands = 1 : i64, tpu.core_type = #tpu.core_type<tc>} {
    tpu.enqueue_dma source(%arg0 : memref<16x128xf32, #tpu.memory_space<any>>) target(%arg1 : memref<16x128xf32, #tpu.memory_space<any>>) target_semaphore(%arg2 : memref<!tpu.dma_semaphore, #tpu.memory_space<semaphore_mem>>)
    tpu.wait_dma2 semaphore(%arg2 : memref<!tpu.dma_semaphore, #tpu.memory_space<semaphore_mem>>) src(%arg0 : memref<16x128xf32, #tpu.memory_space<any>>) dst(%arg1 : memref<16x128xf32, #tpu.memory_space<any>>)
    return
  }
}

</mosaic_0001>

<bundles_post_ra>
// kernel: tpu_custom_call.1
= control target key start
LH: loop header
LB: loop body
LE: loop exit
PB: predicated region body
PF: predicated region fallthrough
CT: control target
= control target key end

     0   :  { %s32_s12 = smov [#allocation2]   ;;  %s33_s13 = smov [#allocation3]   ;;  %s51_s0 = inlined_call_operand.hbm [shape: f32[16,128], index: 0, kind: input, shape index: {}]   ;;  %s52_s1 = inlined_call_operand.hbm [shape: f32[16,128], index: 1, kind: output, shape index: {}]  }
   0x1   :  { %s10_s8 = sshll.u32 %s51_s0, 4  ;;  %s12_s11 = sshll.u32 %s52_s1, 4  ;;  %s11_s8 = int_to_ptr.hbm [resolvable:$true] %s10_s8  ;;  %s13_s11 = int_to_ptr.hbm [resolvable:$true] %s12_s11 }
   0x2   :  { %s34_s14 = smov 0  }
   0x3   :  { %16 = dma.general %s11_s8, 256, %s13_s11, %s32_s12, %s33_s13, [#allocation4], %s34_s14, 0  }
   0x4   :  { %30 = dma.done.wait [#allocation2], 256 }
   0x5   :  { %31 = vsyncadd [#allocation2], 4294967040 }
   0x6   :  { %20 = vsyncmov [#allocation2] }
   0x9   :  { %s21_s15 = vpop.sfrf %20 }
   0xa   :  { %p26_p0 = scmp.ne.s32.totalorder %s21_s15, 0 }
   0xc   :  { %25 = shalt.err (%p26_p0)  }

</bundles_post_ra>
